<compile_context>
chip_gen: v7x
topology: tpu7x:2x2x1
jax: 0.10.0
libtpu: 0.0.40
codegen_flags: <defaults>
</compile_context>

<pallas_src>
import functools

import jax
import jax.numpy as jnp
from jax import lax
from jax.experimental import pallas as pl
from jax.experimental.pallas import tpu as pltpu

BLOCK_SIZE = 8     # block_size in the PyTorch script (max sequence length)
EMBED_SIZE = 64    # embed_size
HEAD_SIZE = 32     # head_size argument to Head(...)
DROPOUT = 0.0      # dropout == 0 in the script -> identity (no-op)

NEG_BIG = -1e30    # finite "minus infinity" for the causal mask


def _head_kernel(x_ref, wqkv_ref, o_ref, qkv_ref, *, head_size, sub):
    """x_ref: (Bblk, T, C) f32; wqkv_ref: (C, 3H) bf16 [k | q*scale | v];
    o_ref: (Bblk, T, H); qkv_ref: (Bblk, T, 3H) f32 VMEM scratch."""
    b_blk, t, c = x_ref.shape
    h = head_size

    # ---- fused QKV projection on the whole (Bblk*T, C) slab, bf16 -> f32 ----
    x2d = x_ref[...].reshape(b_blk * t, c).astype(jnp.bfloat16)
    qkv = jnp.dot(x2d, wqkv_ref[...], preferred_element_type=jnp.float32)
    qkv_ref[...] = qkv.reshape(b_blk, t, 3 * h)

    # ---- batch-invariant causal mask, built once per grid step ----
    row = lax.broadcasted_iota(jnp.int32, (t, t), 0)
    col = lax.broadcasted_iota(jnp.int32, (t, t), 1)
    causal = (col <= row)[None, :, :]                                   # (1, T, T)

    n_sub = b_blk // sub  # static; wrapper guarantees sub divides b_blk

    def body(s, carry):
        b0 = pl.multiple_of(s * sub, sub)
        slab = qkv_ref[pl.ds(b0, sub), :, :]                            # (sub, T, 3H)
        k = slab[..., 0 * h:1 * h]
        q = slab[..., 1 * h:2 * h]                                      # scale pre-folded
        v = slab[..., 2 * h:3 * h]

        # scores: batched contraction over H (no explicit k.T through XLU)
        wei = jnp.einsum('bqd,bkd->bqk', q, k,
                         preferred_element_type=jnp.float32)            # (sub, T, T)
        wei = jnp.where(causal, wei, NEG_BIG)

        # softmax in f32; per-row divide via EUP reciprocal
        wei = wei - jnp.max(wei, axis=-1, keepdims=True)
        p = jnp.exp(wei)
        p = p * pl.reciprocal(jnp.sum(p, axis=-1, keepdims=True), approx=True)

        # dropout(p=0) is identity; nothing to do.
        # TODO(synk): if dropout > 0 were needed, build the mask in-kernel with
        # pltpu.prng_seed + pltpu.stateful_bernoulli.

        out = jnp.einsum('bqk,bkd->bqd',
                         p.astype(jnp.bfloat16), v.astype(jnp.bfloat16),
                         preferred_element_type=jnp.float32)            # (sub, T, H)
        o_ref[pl.ds(b0, sub), :, :] = out.astype(o_ref.dtype)
        return carry

    lax.fori_loop(0, n_sub, body, 0, unroll=True)


def _pick_chunk(batch, seq, *, max_rows=1024, min_rows=128, sub_max=8):
    """Pick (batch chunk per grid step, in-kernel softmax sub-chunk size)."""
    b_blk = max(1, min(batch, max_rows // max(seq, 1)))
    # Ensure >= 2 grid steps (v7x megacore sharding + pipelined DMA) whenever
    # each half of the batch still provides a reasonable number of MXU rows.
    half = -(-batch // 2)  # cdiv(batch, 2)
    if batch > 1 and half * seq >= min_rows:
        b_blk = min(b_blk, half)
    if b_blk > sub_max:
        b_blk -= b_blk % sub_max   # keep the softmax sub-chunk an exact divisor
        sub = sub_max
    else:
        sub = b_blk
    return b_blk, sub


def head_forward(x, w_key, w_query, w_value):
    """x: (B, T, C) float32; w_*: (C, H) float32. Returns (B, T, H)."""
    B, T, C = x.shape
    H = w_key.shape[1]
    assert T <= BLOCK_SIZE and C == EMBED_SIZE

    # Fuse the three projections into one (C, 3H) weight, fold the 1/sqrt(H)
    # score scale into the query columns, and pre-cast to bf16 once (half-width
    # resident weight DMA, no per-step VPU cast in the kernel).
    # TODO(synk): in a full model, fuse all heads of MultiHeadAttention here so
    # the output last dim becomes n_heads*H (>=128 -> lane-dense, unmasked
    # stores) and the QKV matmul N fills the MXU columns.
    scale = 1.0 / (H ** 0.5)
    w_qkv = jnp.concatenate([w_key, w_query * scale, w_value], axis=1)
    w_qkv = w_qkv.astype(jnp.bfloat16)                                   # (C, 3H)

    b_blk, sub = _pick_chunk(B, T)
    grid = (pl.cdiv(B, b_blk),)

    kernel = functools.partial(_head_kernel, head_size=H, sub=sub)

    return pl.pallas_call(
        kernel,
        out_shape=jax.ShapeDtypeStruct((B, T, H), x.dtype),
        grid_spec=pltpu.PrefetchScalarGridSpec(
            num_scalar_prefetch=0,
            grid=grid,
            in_specs=[
                # one batch *chunk* per grid step (partial last block allowed)
                pl.BlockSpec((b_blk, T, C), lambda b: (b, 0, 0)),
                # fused bf16 weight, same block every step (stays resident)
                pl.BlockSpec((C, 3 * H), lambda b: (0, 0)),
            ],
            out_specs=pl.BlockSpec((b_blk, T, H), lambda b: (b, 0, 0)),
            scratch_shapes=[pltpu.VMEM((b_blk, T, 3 * H), jnp.float32)],
        ),
        compiler_params=pltpu.CompilerParams(
            dimension_semantics=("parallel",),
            # KB-scale blocks; explicit budget kept <= 32 MiB so it is safe on
            # v7x's 64 MiB physical VMEM as well.
            vmem_limit_bytes=32 * 1024 * 1024,
        ),
    )(x, w_qkv)


# ----------------------------------------------------------------------------
# References
# ----------------------------------------------------------------------------

def reference_head_f32(x, w_key, w_query, w_value):
    """Pure-JAX f32 reference mirroring the PyTorch forward exactly."""
    H = w_key.shape[1]
    k = x @ w_key
    q = x @ w_query
    v = x @ w_value
    wei = (q @ jnp.swapaxes(k, 2, 1)) / (H ** 0.5)
    T = x.shape[1]
    tril = jnp.tril(jnp.ones((T, T), dtype=bool))
    wei = jnp.where(tril[None, :, :], wei, -jnp.inf)
    wei = jax.nn.softmax(wei, axis=2)
    return wei @ v


def reference_head_mixed(x, w_key, w_query, w_value):
    """Reference mirroring the kernel's mixed-precision policy (bf16 MXU
    operands, f32 accumulation/softmax, exact division)."""
    B, T, C = x.shape
    H = w_key.shape[1]
    scale = 1.0 / (H ** 0.5)
    w_qkv = jnp.concatenate([w_key, w_query * scale, w_value], axis=1).astype(jnp.bfloat16)
    qkv = jnp.dot(x.reshape(B * T, C).astype(jnp.bfloat16), w_qkv,
                  preferred_element_type=jnp.float32)
    k = qkv[:, 0 * H:1 * H].reshape(B, T, H)
    q = qkv[:, 1 * H:2 * H].reshape(B, T, H)
    v = qkv[:, 2 * H:3 * H].reshape(B, T, H)
    wei = jnp.einsum('bqd,bkd->bqk', q, k, preferred_element_type=jnp.float32)
    tril = jnp.tril(jnp.ones((T, T), dtype=bool))
    wei = jnp.where(tril[None, :, :], wei, NEG_BIG)
    wei = wei - jnp.max(wei, axis=-1, keepdims=True)
    p = jnp.exp(wei)
    p = p / jnp.sum(p, axis=-1, keepdims=True)
    return jnp.einsum('bqk,bkd->bqd',
                      p.astype(jnp.bfloat16), v.astype(jnp.bfloat16),
                      preferred_element_type=jnp.float32)


if __name__ == "__main__":
    key = jax.random.PRNGKey(0)
    kx, kk, kq, kv = jax.random.split(key, 4)

    B, T, C, H = 2, BLOCK_SIZE, EMBED_SIZE, HEAD_SIZE

    x = jax.random.normal(kx, (B, T, C), dtype=jnp.float32)
    # deterministic parameter init (nn.Linear-style scale 1/sqrt(C))
    w_scale = 1.0 / (C ** 0.5)
    w_key = jax.random.uniform(kk, (C, H), jnp.float32, -w_scale, w_scale)
    w_query = jax.random.uniform(kq, (C, H), jnp.float32, -w_scale, w_scale)
    w_value = jax.random.uniform(kv, (C, H), jnp.float32, -w_scale, w_scale)

    out = head_forward(x, w_key, w_query, w_value)
    out = jax.block_until_ready(out)
    assert out.shape == (B, T, H)

    # tight check vs a reference using the same precision policy
    ref_mixed = reference_head_mixed(x, w_key, w_query, w_value)
    assert jnp.allclose(out, ref_mixed, atol=1e-2, rtol=1e-2), \
        "mismatch vs mixed-precision reference"

    # looser sanity check vs the exact f32 PyTorch-equivalent math
    ref_f32 = reference_head_f32(x, w_key, w_query, w_value)
    assert jnp.allclose(out, ref_f32, atol=5e-2, rtol=5e-2), \
        "mismatch vs f32 reference"

    print("KERNEL_OK")
</pallas_src>

<mosaic_0001>
module attributes {stable_mosaic.version = 11 : i64} {
  func.func @_head_kernel(%arg0: i32, %arg1: memref<2x8x64xf32, #tpu.memory_space<vmem>>, %arg2: memref<64x96xbf16, #tpu.memory_space<vmem>>, %arg3: memref<2x8x32xf32, #tpu.memory_space<vmem>>, %arg4: memref<2x8x96xf32, #tpu.memory_space<vmem>>) attributes {dimension_semantics = [#tpu.dimension_semantics<parallel>], iteration_bounds = array<i64: 1>, scalar_prefetch = 0 : i64, scratch_operands = 1 : i64, tpu.core_type = #tpu.core_type<tc>, window_params = [{transform_indices = @transform_0, window_bounds = array<i64: 2, 8, 64>}, {pipeline_mode = #tpu.pipeline_mode<synchronous>, transform_indices = @transform_1, window_bounds = array<i64: 64, 96>}, {transform_indices = @transform_2, window_bounds = array<i64: 2, 8, 32>}]} {
    %c0 = arith.constant 0 : index
    %c0_0 = arith.constant 0 : index
    %c0_1 = arith.constant 0 : index
    %0 = vector.load %arg1[%c0, %c0_0, %c0_1] : memref<2x8x64xf32, #tpu.memory_space<vmem>>, vector<2x8x64xf32>
    %1 = vector.shape_cast %0 : vector<2x8x64xf32> to vector<16x64xf32>
    %2 = arith.truncf %1 : vector<16x64xf32> to vector<16x64xbf16>
    %c0_2 = arith.constant 0 : index
    %c0_3 = arith.constant 0 : index
    %3 = vector.load %arg2[%c0_2, %c0_3] : memref<64x96xbf16, #tpu.memory_space<vmem>>, vector<64x96xbf16>
    %cst = arith.constant dense<0.000000e+00> : vector<16x96xf32>
    %4 = tpu.matmul %2, %3, %cst {dimension_numbers = #tpu.dot_dimension_numbers<[1], [0], [0], [1], [0, 0, 1, 1], [], []>} : vector<16x64xbf16>, vector<64x96xbf16>, vector<16x96xf32> -> vector<16x96xf32>
    %5 = vector.shape_cast %4 : vector<16x96xf32> to vector<2x8x96xf32>
    %c0_4 = arith.constant 0 : index
    %c0_5 = arith.constant 0 : index
    %c0_6 = arith.constant 0 : index
    %6 = vector.load %arg4[%c0_4, %c0_5, %c0_6] : memref<2x8x96xf32, #tpu.memory_space<vmem>>, vector<2x8x96xf32>
    tpu.vector_store %arg4[%c0_4, %c0_5, %c0_6], %5 {strides = array<i32>} : memref<2x8x96xf32, #tpu.memory_space<vmem>>, vector<2x8x96xf32>,
    %7 = tpu.iota {dimensions = array<i32: 0>} : vector<8x8xi32>
    %8 = tpu.iota {dimensions = array<i32: 1>} : vector<8x8xi32>
    %9 = arith.cmpi sle, %8, %7 : vector<8x8xi32>
    %10 = vector.shape_cast %9 : vector<8x8xi1> to vector<1x8x8xi1>
    %c0_i32 = arith.constant 0 : i32
    %c2_i32 = arith.constant 2 : i32
    %11 = arith.muli %c0_i32, %c2_i32 : i32
    %12 = tpu.assume_multiple %11, 2 : i32
    %13 = arith.index_cast %12 : i32 to index
    %c0_7 = arith.constant 0 : index
    %c0_8 = arith.constant 0 : index
    %14 = vector.load %arg4[%13, %c0_7, %c0_8] : memref<2x8x96xf32, #tpu.memory_space<vmem>>, vector<2x8x96xf32>
    %15 = vector.extract_strided_slice %14 {offsets = [0, 0, 0], sizes = [2, 8, 32], strides = [1, 1, 1]} : vector<2x8x96xf32> to vector<2x8x32xf32>
    %16 = vector.extract_strided_slice %14 {offsets = [0, 0, 32], sizes = [2, 8, 32], strides = [1, 1, 1]} : vector<2x8x96xf32> to vector<2x8x32xf32>
    %17 = vector.extract_strided_slice %14 {offsets = [0, 0, 64], sizes = [2, 8, 32], strides = [1, 1, 1]} : vector<2x8x96xf32> to vector<2x8x32xf32>
    "tpu.trace_start"() <{level = 10 : i32, message = "bqd,bkd->bqk"}> : () -> ()
    %cst_9 = arith.constant dense<0.000000e+00> : vector<2x8x8xf32>
    %18 = tpu.matmul %16, %15, %cst_9 {dimension_numbers = #tpu.dot_dimension_numbers<[2], [2], [1], [1], [0, 0, 0, 1, 1, 1], [0], [0]>} : vector<2x8x32xf32>, vector<2x8x32xf32>, vector<2x8x8xf32> -> vector<2x8x8xf32>
    %cst_10 = arith.constant -1.000000e+30 : f32
    "tpu.trace_stop"() : () -> ()
    %19 = vector.shape_cast %10 : vector<1x8x8xi1> to vector<1x8x8xi1>
    %20 = vector.broadcast %19 : vector<1x8x8xi1> to vector<2x8x8xi1>
    %21 = vector.broadcast %cst_10 : f32 to vector<2x8x8xf32>
    %22 = arith.select %20, %18, %21 : vector<2x8x8xi1>, vector<2x8x8xf32>
    %cst_11 = arith.constant dense<0xFF800000> : vector<2x8xf32>
    %23 = vector.multi_reduction <maximumf>, %22, %cst_11 [2] : vector<2x8x8xf32> to vector<2x8xf32>
    %24 = vector.shape_cast %23 : vector<2x8xf32> to vector<2x8x1xf32>
    %25 = vector.broadcast %24 : vector<2x8x1xf32> to vector<2x8x8xf32>
    %26 = arith.subf %22, %25 : vector<2x8x8xf32>
    %27 = math.exp %26 : vector<2x8x8xf32>
    %cst_12 = arith.constant dense<0.000000e+00> : vector<2x8xf32>
    %28 = vector.multi_reduction <add>, %27, %cst_12 [2] : vector<2x8x8xf32> to vector<2x8xf32>
    %29 = vector.shape_cast %28 : vector<2x8xf32> to vector<2x8x1xf32>
    %30 = tpu.reciprocal %29 {approx = true} : vector<2x8x1xf32> -> vector<2x8x1xf32>
    %31 = vector.broadcast %30 : vector<2x8x1xf32> to vector<2x8x8xf32>
    %32 = arith.mulf %27, %31 : vector<2x8x8xf32>
    %33 = arith.truncf %32 : vector<2x8x8xf32> to vector<2x8x8xbf16>
    %34 = arith.truncf %17 : vector<2x8x32xf32> to vector<2x8x32xbf16>
    "tpu.trace_start"() <{level = 10 : i32, message = "bqk,bkd->bqd"}> : () -> ()
    %cst_13 = arith.constant dense<0.000000e+00> : vector<2x8x32xf32>
    %35 = tpu.matmul %33, %34, %cst_13 {dimension_numbers = #tpu.dot_dimension_numbers<[2], [1], [1], [2], [0, 0, 0, 1, 1, 2], [0], [0]>} : vector<2x8x8xbf16>, vector<2x8x32xbf16>, vector<2x8x32xf32> -> vector<2x8x32xf32>
    "tpu.trace_stop"() : () -> ()
    %36 = arith.index_cast %12 : i32 to index
    %c0_14 = arith.constant 0 : index
    %c0_15 = arith.constant 0 : index
    %37 = vector.load %arg3[%36, %c0_14, %c0_15] : memref<2x8x32xf32, #tpu.memory_space<vmem>>, vector<2x8x32xf32>
    tpu.vector_store %arg3[%36, %c0_14, %c0_15], %35 {strides = array<i32>} : memref<2x8x32xf32, #tpu.memory_space<vmem>>, vector<2x8x32xf32>,
    %c1_i32 = arith.constant 1 : i32
    return
  }
  func.func @transform_0(%arg0: i32) -> (i32, i32, i32) {
    %c0_i32 = arith.constant 0 : i32
    %c0_i32_0 = arith.constant 0 : i32
    %c0_i32_1 = arith.constant 0 : i32
    return %arg0, %c0_i32, %c0_i32_0 : i32, i32, i32
  }
  func.func @transform_1(%arg0: i32) -> (i32, i32) {
    %c0_i32 = arith.constant 0 : i32
    %c0_i32_0 = arith.constant 0 : i32
    %c0_i32_1 = arith.constant 0 : i32
    return %c0_i32, %c0_i32_0 : i32, i32
  }
  func.func @transform_2(%arg0: i32) -> (i32, i32, i32) {
    %c0_i32 = arith.constant 0 : i32
    %c0_i32_0 = arith.constant 0 : i32
    %c0_i32_1 = arith.constant 0 : i32
    return %arg0, %c0_i32, %c0_i32_0 : i32, i32, i32
  }
}

</mosaic_0001>

<bundles_post_ra>
// kernel: tpu_custom_call.1
= control target key start
LH: loop header
LB: loop body
LE: loop exit
PB: predicated region body
PF: predicated region fallthrough
CT: control target
= control target key end

     0   :  { %7 = vsyncpa [#allocation4], 0  ;;  %s694_s0 = inlined_call_operand.hbm [shape: f32[2,8,64], index: 0, kind: input, shape index: {}]   ;;  %s695_s1 = inlined_call_operand.hbm [shape: bf16[64,96], index: 1, kind: input, shape index: {}]   ;;  %s696_s2 = inlined_call_operand.hbm [shape: f32[2,8,32], index: 2, kind: output, shape index: {}]  }
   0x1   :  { %8 = vsyncpa [#allocation7], 0 }
   0x2   :  { %9 = vsyncpa [#allocation5], 0  ;;  %s591_s9 = smov [#allocation3]   ;;  %s519_s13 = scalar_lea.hbm %s694_s0, 256 }
   0x3   :  { %s15_s10 = sshll.u32 %s591_s9, 4  ;;  %p520_p0 = scmp.ne.s32.totalorder %s694_s0, %s519_s13  ;;  %s16_s10 = int_to_ptr.vmem [resolvable:$true] %s15_s10 }
   0x4   :  { %p523_p1 = scmp.lt.u32.totalorder %s519_s13, %s694_s0 }
   0x6   :  { %p525_p2 = pnand %p523_p1, %p520_p0 }
   0x8   :  { %528 = shalt.err (!%p525_p2)
}
   0x9   :  { %s529_s18 = scalar_lea.vmem %s16_s10, 256  ;;  %p534_p4 = scmp.lt.s32.totalorder %s16_s10, %s16_s10 }
   0xa   :  { %p530_p3 = scmp.ne.s32.totalorder %s16_s10, %s529_s18  ;;  %p535_p5 = scmp.lt.s32.totalorder %s529_s18, %s529_s18 }
   0xc   :  { %p536_p6 = por %p535_p5, %p534_p4 }
   0xe   :  { %p537_p7 = pnand %p536_p6, %p530_p3 }
  0x10   :  { %540 = shalt.err (!%p537_p7)
}
  0x11   :  { %s592_s19 = smov 128   ;;  %s593_s20 = smov 8  }
  0x12   :  { %21 = dma.hbm_to_vmem [thread:$0]  %s694_s0, 256, %s16_s10, [#allocation4], %s592_s19, %s592_s19, %s593_s20  }
  0x13   :  { %s594_s23 = smov [#allocation6]   ;;  %s541_s27 = scalar_lea.hbm %s695_s1, 512 }
  0x14   :  { %s27_s24 = sshll.u32 %s594_s23, 4  ;;  %p542_p8 = scmp.ne.s32.totalorder %s695_s1, %s541_s27  ;;  %s28_s24 = int_to_ptr.vmem [resolvable:$true] %s27_s24 }
  0x15   :  { %p545_p9 = scmp.lt.u32.totalorder %s541_s27, %s695_s1 }
  0x17   :  { %p547_p10 = pnand %p545_p9, %p542_p8 }
  0x19   :  { %550 = shalt.err (!%p547_p10)
}
  0x1a   :  { %s551_s4 = scalar_lea.vmem %s28_s24, 512  ;;  %p556_p12 = scmp.lt.s32.totalorder %s28_s24, %s28_s24 }
  0x1b   :  { %p552_p11 = scmp.ne.s32.totalorder %s28_s24, %s551_s4  ;;  %p557_p13 = scmp.lt.s32.totalorder %s551_s4, %s551_s4 }
  0x1d   :  { %p558_p0 = por %p557_p13, %p556_p12 }
  0x1f   :  { %p559_p1 = pnand %p558_p0, %p552_p11 }
  0x21   :  { %562 = shalt.err (!%p559_p1)
}
  0x22   :  { %s595_s0 = smov 64   ;;  %s596_s5 = smov 4  }
  0x23   :  { %33 = dma.hbm_to_vmem [thread:$0]  %s695_s1, 512, %s28_s24, [#allocation7], %s595_s0, %s595_s0, %s596_s5  }
  0x24   :  { %585 = dma.done.wait [#allocation4], 256  }
  0x25   :  { %586 = vsyncadd [#allocation4], 4294967040 }
  0x26   :  { %587 = dma.done.wait [#allocation7], 512  }
  0x27   :  { %588 = vsyncadd [#allocation7], 4294966784  ;;  %v597_v0 = vmov 0.0   ;;  %vm598_vm0 = vmmov 0   ;;  %v507_v1 = vld [vmem:[#allocation6] sm:$0xff]   ;;  %v508_v2 = vld [vmem:[#allocation6 + $0x8] sm:$0xff]   ;;  %v124_v16 = vlaneseq }
  0x28   :  { %463 = vmatprep.subr.bf16.mxu0 %v597_v0  ;;  %471 = vmatprep.mubr.msk.bf16.mxu0 %vm598_vm0, %v597_v0  ;;  %v509_v3 = vld [vmem:[#allocation6 + $0x10] sm:$0xff]   ;;  %v510_v4 = vld [vmem:[#allocation6 + $0x18] sm:$0xff]   ;;  %vm76_vm1 = vcmask 523264   ;;  %vm121_vm2 = vcmask 785408   ;;  %vm136_vm3 = vcmask 261120   ;;  %s599_s1 = smov 96  }
  0x29   :  { %475 = vmatprep.subr.mxu1 %v597_v0  ;;  %477 = vmatprep.mubr.msk.f32.mxu1 %vm598_vm0, %v597_v0  ;;  %v41_v5 = vld [vmem:[#allocation3] sm:$0xff]  ;;  %v42_v6 = vld [vmem:[#allocation3 + $0x8] sm:$0xff]  ;;  %v125_v17 = vshrl.u32 %v124_v16, 7  ;;  %v127_v18 = vand.u32 127, %v124_v16  ;;  %vm292_vm5 = vcmask 64512   ;;  %vm325_vm6 = vcmask 1043456  }
  0x2a   :  { %464 = vmatpush3.bf16.msra.mxu0 %v507_v1  ;;  %v43_v7 = vpack.c.bf16 %v42_v6, %v41_v5  ;;  %s600_s8 = smov [#allocation8]  }
  0x2b   :  { %465 = vmatprep.subr.bf16.mxu0 %v597_v0  ;;  %vm128_vm4 = vcmp.le.s32.totalorder %v127_v18, %v125_v17  ;;  %s426_s9 = sshll.u32 %s600_s8, 4  ;;  %s427_s9 = int_to_ptr.vmem [resolvable:$true] %s426_s9 }
  0x2c   :  { %s563_s10 = scalar_lea.vmem %s427_s9, 256  ;;  %p568_p3 = scmp.lt.s32.totalorder %s427_s9, %s427_s9 }
  0x2d   :  { %p564_p2 = scmp.ne.s32.totalorder %s427_s9, %s563_s10  ;;  %p569_p4 = scmp.lt.s32.totalorder %s563_s10, %s563_s10 }
  0x2e   :  { %466 = vmatpush3.bf16.msra.mxu0 %v508_v2 }
  0x2f   :  { %467 = vmatprep.subr.bf16.mxu0 %v597_v0  ;;  %p570_p5 = por %p569_p4, %p568_p3 }
  0x31   :  { %p571_p6 = pnand %p570_p5, %p564_p2 }
  0x32   :  { %468 = vmatpush3.bf16.msra.mxu0 %v509_v3 }
  0x33   :  { %469 = vmatprep.subr.bf16.mxu0 %v597_v0 }
  0x36   :  { %470 = vmatpush3.bf16.msra.mxu0 %v510_v4 }
  0x39   :  { %472 = vmatmul.mubr.msk.bf16.vlgmr.msra.gmra.mrb[0].mxu0 %vm76_vm1, %v43_v7 }
 0x10c   :  { %v114_v8 = vpop.f32.mrb[0].mxu0 }
 0x10d   :  { %122 = vst.msk [vmem:[#allocation2] sm:$0xff] %vm121_vm2, %v114_v8  ;;  %v473_v9 = vpop.f32.mrb[1].mxu0 }
 0x10e   :  { %v117_v10 = vpop.f32.mrb[2].mxu0 }
 0x10f   :  { %123 = vst.msk [vmem:[#allocation2 + $0x8] sm:$0xff] %vm121_vm2, %v117_v10  ;;  %v474_v11 = vpop.f32.mrb[3].mxu0 }
 0x114   :  { %v131_v12 = vld [vmem:[#allocation2] sm:$0xff] }
 0x115   :  { %134 = vrot.lane.b32.xlu0 %v131_v12, %s599_s1  ;;  %476 = vmatpush3.xpose.msk.msra.mxu1 %vm136_vm3, %v131_v12  ;;  %v317_v27 = vpack.c.bf16 %v131_v12, %v131_v12 }
 0x116   :  { %480 = vmatprep.subr.mxu1 %v597_v0  ;;  %v132_v13 = vld [vmem:[#allocation2 + $0x8] sm:$0xff] }
 0x117   :  { %v318_v40 = vpack.c.bf16 %v132_v13, %v132_v13 }
 0x119   :  { %212 = vrot.lane.b32.xlu0 %v132_v13, %s599_s1 }
 0x187   :  { %v135_v14 = vpop.permute.xlu0 %134 }
 0x188   :  { %478 = vmatmul.mubr.msk.f32.vlgmr.msra.gmra.mrb[0].mxu1 %vm136_vm3, %v135_v14 }
 0x189   :  { %481 = vmatpush3.xpose.msk.msra.mxu1 %vm136_vm3, %v132_v13  ;;  %482 = vmatprep.mubr.msk.f32.mxu1 %vm598_vm0, %v597_v0 }
 0x18a   :  { %485 = vmatprep.subr.bf16.mxu1 %v597_v0 }
 0x18b   :  { %v213_v15 = vpop.permute.xlu0 %212 }
 0x18c   :  { %483 = vmatmul.mubr.msk.f32.vlgmr.msra.gmra.mrb[2].mxu1 %vm136_vm3, %v213_v15 }
 0x18d   :  { %487 = vmatprep.mubr.msk.bf16.mxu1 %vm598_vm0, %v597_v0 }
 0x25b   :  { %v207_v19 = vpop.f32.mrb[0].mxu1 }
 0x25c   :  { %v290_v20 = vsel %vm128_vm4, %v207_v19, -1e+30  ;;  %v479_v21 = vpop.f32.mrb[1].mxu1 }
 0x25d   :  { %v293_v22 = vsel %vm292_vm5, %v290_v20, -inf }
 0x25e   :  { %294 = vmax.xlane.f32.xlu1 %v293_v22 }
 0x25f   :  { %v284_v23 = vpop.f32.mrb[2].mxu1 }
 0x260   :  { %v291_v24 = vsel %vm128_vm4, %v284_v23, -1e+30  ;;  %v484_v25 = vpop.f32.mrb[3].mxu1 }
 0x261   :  { %v296_v26 = vsel %vm292_vm5, %v291_v24, -inf }
 0x262   :  { %297 = vmax.xlane.f32.xlu1 %v296_v26 }
 0x273   :  { %320 = vrot.lane.b32.xlu1 %v317_v27, %s595_s0 }
 0x2eb   :  { %v295_v28 = vpop.xlane.xlu1 %294 }
 0x2ec   :  { %v299_v29 = vsub.f32 %v290_v20, %v295_v28 }
 0x2ee   :  { %v301_v30 = vmul.f32 1.442695, %v299_v29 }
 0x2ef   :  { %v298_v31 = vpop.xlane.xlu1 %297 }
 0x2f0   :  { %511 = vpow2.f32 %v301_v30  ;;  %v300_v32 = vsub.f32 %v291_v24, %v298_v31 }
 0x2f2   :  { %v303_v33 = vmul.f32 1.442695, %v300_v32 }
 0x2f3   :  { %v321_v34 = vpop.permute.xlu1 %320 }
 0x2f4   :  { %513 = vpow2.f32 %v303_v33  ;;  %v327_v35 = vsel %vm325_vm6, %v321_v34, 0 }
 0x2f5   :  { %486 = vmatpush3.bf16.msra.mxu1 %v327_v35 }
 0x2f6   :  { %491 = vmatprep.subr.bf16.mxu1 %v597_v0 }
 0x2fa   :  { %v512_v36 = vpop.eup %511 }
 0x2fb   :  { %v305_v37 = vsel %vm292_vm5, %v512_v36, 0.0 }
 0x2fc   :  { %306 = vadd.xlane.f32.xlu0 %v305_v37 }
 0x2fe   :  { %v514_v38 = vpop.eup %513 }
 0x2ff   :  { %v308_v39 = vsel %vm292_vm5, %v514_v38, 0.0 }
 0x300   :  { %309 = vadd.xlane.f32.xlu1 %v308_v39 }
 0x311   :  { %370 = vrot.lane.b32.xlu1 %v318_v40, %s595_s0 }
 0x389   :  { %v307_v41 = vpop.xlane.xlu0 %306 }
 0x38a   :  { %515 = vrcp.f32 %v307_v41 }
 0x38d   :  { %v310_v42 = vpop.xlane.xlu1 %309 }
 0x38e   :  { %517 = vrcp.f32 %v310_v42 }
 0x391   :  { %v371_v45 = vpop.permute.xlu1 %370 }
 0x392   :  { %v376_v48 = vsel %vm325_vm6, %v371_v45, 0 }
 0x394   :  { %v516_v43 = vpop.eup %515 }
 0x395   :  { %v313_v44 = vmul.f32 %v516_v43, %v512_v36 }
 0x397   :  { %v315_v46 = vpack.c.bf16 %v313_v44, %v313_v44 }
 0x398   :  { %v518_v47 = vpop.eup %517 }
 0x399   :  { %488 = vmatmul.mubr.msk.bf16.vlgmr.msra.gmra.mrb[4].mxu1 %vm292_vm5, %v315_v46  ;;  %v314_v49 = vmul.f32 %v518_v47, %v514_v38 }
 0x39a   :  { %492 = vmatpush3.bf16.msra.mxu1 %v376_v48  ;;  %493 = vmatprep.mubr.msk.bf16.mxu1 %vm598_vm0, %v597_v0 }
 0x39b   :  { %v316_v50 = vpack.c.bf16 %v314_v49, %v314_v49 }
 0x3a1   :  { %494 = vmatmul.mubr.msk.bf16.vlgmr.msra.gmra.mrb[8].mxu1 %vm292_vm5, %v316_v50 }
 0x46c   :  { %v363_v51 = vpop.f32.mrb[4].mxu1 }
 0x46d   :  { %419 = vst.msk [vmem:[#allocation8] sm:$0xff] %vm136_vm3, %v363_v51  ;;  %v489_v52 = vpop.f32.mrb[5].mxu1 }
 0x46e   :  { %v366_v53 = vpop.f32.mrb[6].mxu1 }
 0x46f   :  { %v490_v54 = vpop.f32.mrb[7].mxu1 }
 0x474   :  { %v412_v55 = vpop.f32.mrb[8].mxu1 }
 0x475   :  { %420 = vst.msk [vmem:[#allocation8 + $0x8] sm:$0xff] %vm136_vm3, %v412_v55  ;;  %v495_v56 = vpop.f32.mrb[9].mxu1 }
 0x476   :  { %v415_v57 = vpop.f32.mrb[10].mxu1 }
 0x477   :  { %574 = shalt.err (!%p571_p6)
}
 0x478   :  { %s575_s13 = scalar_lea.hbm %s696_s2, 256 }
 0x479   :  { %p576_p7 = scmp.ne.s32.totalorder %s696_s2, %s575_s13  ;;  %p579_p8 = scmp.lt.u32.totalorder %s575_s13, %s696_s2 }
 0x47b   :  { %p581_p9 = pnand %p579_p8, %p576_p7 }
 0x47d   :  { %584 = shalt.err (!%p581_p9)
}
 0x47e   :  { %432 = dma.vmem_to_hbm [thread:$0]  %s427_s9, 256, %s696_s2, [#allocation5], %s592_s19, %s592_s19, %s593_s20   ;;  %v496_v58 = vpop.f32.mrb[11].mxu1 }
 0x47f   :  { %589 = dma.done.wait [#allocation5], 256  }
 0x480   :  { %590 = vsyncadd [#allocation5], 4294967040 }
 0x481   :  { %436 = vsyncpa [#allocation4], 1 }
 0x482   :  { %437 = vsyncpa [#allocation7], 1 }
 0x483   :  { %438 = vsyncpa [#allocation5], 1 }

</bundles_post_ra>
